<compile_context>
chip_gen: v7x
topology: tpu7x:2x2x1
jax: 0.10.0
libtpu: 0.0.40
codegen_flags: <defaults>
</compile_context>

<pallas_src>
import jax
import jax.numpy as jnp
from jax.experimental import pallas as pl
from jax.experimental.pallas import tpu as pltpu

FLAT_DIM = 512  # output inner dim (4 * 128 lanes)


def _flatten_dma_kernel(x_hbm_ref, o_hbm_ref, sem):
    # Single HBM->HBM DMA of the already-flattened (n_rows, 512) buffer.
    # No VMEM staging, no grid: the DMA engine streams at HBM bandwidth.
    copy = pltpu.make_async_copy(x_hbm_ref, o_hbm_ref, sem)
    copy.start()
    copy.wait()


def flatten_forward(x: jax.Array, *, force_pallas_copy: bool = True) -> jax.Array:
    """Equivalent of torch `x.view(-1, 512)`.

    With `force_pallas_copy=False` this is a pure metadata reshape (the right
    choice in production).  With the default `True`, a single HBM->HBM DMA
    copy is issued from a Pallas kernel so a kernel remains in the graph.
    """
    total = x.size
    assert total % FLAT_DIM == 0, "total elements must be divisible by 512"
    n_rows = total // FLAT_DIM

    # Metadata-only reshape: presents the contiguous buffer as (n_rows, 512).
    x2d = jnp.reshape(x, (n_rows, FLAT_DIM))

    # TODO(synk): in production, return x2d here (or fold the flatten into the
    # consumer kernel's BlockSpec/index_map) — the DMA copy below exists only
    # so a Pallas op stays in the graph.
    if not force_pallas_copy:
        return x2d

    out = pl.pallas_call(
        _flatten_dma_kernel,
        out_shape=jax.ShapeDtypeStruct((n_rows, FLAT_DIM), x.dtype),
        # Raw HBM refs on both sides: no auto-pipelining, no VMEM footprint,
        # no tiling constraints — identical behavior on v5e / v6e / v7x.
        in_specs=[pl.BlockSpec(memory_space=pl.ANY)],
        out_specs=pl.BlockSpec(memory_space=pl.ANY),
        scratch_shapes=[pltpu.SemaphoreType.DMA],
        compiler_params=pltpu.CompilerParams(has_side_effects=True),
    )(x2d)
    return out


if __name__ == "__main__":
    key = jax.random.PRNGKey(0)
    # Small NCHW input whose flattened size is a multiple of 512:
    # (2, 32, 4, 4) -> 2 * 32 * 4 * 4 = 1024 = 2 * 512  => output (2, 512)
    x = jax.random.normal(key, (2, 32, 4, 4), dtype=jnp.float32)

    y = flatten_forward(x)
    y = jax.block_until_ready(y)

    # Correctness check against the pure-JAX reference of x.view(-1, 512).
    ref = jnp.reshape(x, (-1, FLAT_DIM))
    assert y.shape == (2, FLAT_DIM), y.shape
    assert y.dtype == x.dtype
    assert bool(jnp.array_equal(y, ref))

    # Also exercise the metadata-only fast path (production recommendation).
    y_fast = jax.block_until_ready(flatten_forward(x, force_pallas_copy=False))
    assert bool(jnp.array_equal(y_fast, ref))

    print("KERNEL_OK")
</pallas_src>

<mosaic_0001>
module attributes {stable_mosaic.version = 11 : i64} {
  func.func @_flatten_dma_kernel(%arg0: memref<2x512xf32, #tpu.memory_space<any>>, %arg1: memref<2x512xf32, #tpu.memory_space<any>>, %arg2: memref<!tpu.dma_semaphore, #tpu.memory_space<semaphore_mem>>) attributes {dimension_semantics = [], scalar_prefetch = 0 : i64, scratch_operands = 1 : i64, tpu.core_type = #tpu.core_type<tc>} {
    tpu.enqueue_dma source(%arg0 : memref<2x512xf32, #tpu.memory_space<any>>) target(%arg1 : memref<2x512xf32, #tpu.memory_space<any>>) target_semaphore(%arg2 : memref<!tpu.dma_semaphore, #tpu.memory_space<semaphore_mem>>)
    tpu.wait_dma2 semaphore(%arg2 : memref<!tpu.dma_semaphore, #tpu.memory_space<semaphore_mem>>) src(%arg0 : memref<2x512xf32, #tpu.memory_space<any>>) dst(%arg1 : memref<2x512xf32, #tpu.memory_space<any>>)
    return
  }
}

</mosaic_0001>

<bundles_post_ra>
// kernel: tpu_custom_call.1
= control target key start
LH: loop header
LB: loop body
LE: loop exit
PB: predicated region body
PF: predicated region fallthrough
CT: control target
= control target key end

     0   :  { %s35_s6 = smov [#allocation2]   ;;  %s36_s7 = smov [#allocation3]   ;;  %s54_s0 = inlined_call_operand.hbm [shape: f32[2,512], index: 0, kind: input, shape index: {}]   ;;  %s55_s1 = inlined_call_operand.hbm [shape: f32[2,512], index: 1, kind: output, shape index: {}]  }
   0x1   :  { %s37_s8 = smov 0  }
   0x2   :  { %18 = dma.general %s54_s0, 128, %s55_s1, %s35_s6, %s36_s7, [#allocation4], %s37_s8, 0  }
   0x3   :  { %33 = dma.done.wait [#allocation2], 128 }
   0x4   :  { %34 = vsyncadd [#allocation2], 4294967168 }
   0x5   :  { %23 = vsyncmov [#allocation2] }
   0x8   :  { %s24_s13 = vpop.sfrf %23 }
   0x9   :  { %p29_p0 = scmp.ne.s32.totalorder %s24_s13, 0 }
   0xb   :  { %28 = shalt.err (%p29_p0)  }

</bundles_post_ra>
